<compile_context>
chip_gen: v7x
topology: tpu7x:2x2x1
jax: 0.10.0
libtpu: 0.0.40
codegen_flags: <defaults>
</compile_context>

<pallas_src>
import jax
import jax.numpy as jnp
import numpy as np
from jax.experimental import pallas as pl
from jax.experimental.pallas import tpu as pltpu


def attention_cell_kernel(
    h_ref,        # (tb, Hd)   f32   prev hidden
    c_ref,        # (tb, Hd)   f32   prev cell
    bh_ref,       # (tb, T, D) bf16  encoder features
    oh_ref,       # (tb, E)    bf16  char one-hots
    w_i2h_ref,    # (D, Hd)    bf16  i2h.weight.T
    w_h2h_ref,    # (Hd, Hd)   bf16  h2h.weight.T
    b_h2h_ref,    # (1, Hd)    f32
    w_score_ref,  # (1, Hd)    f32   score.weight
    w_ctx_ref,    # (D, 4Hd)   bf16  lstm W_ih[:, :D].T   (cols reordered [i,f,o,g])
    w_emb_ref,    # (E, 4Hd)   bf16  lstm W_ih[:, D:].T   (cols reordered [i,f,o,g])
    w_hh_ref,     # (Hd, 4Hd)  bf16  lstm W_hh.T          (cols reordered [i,f,o,g])
    b_lstm_ref,   # (1, 4Hd)   f32   b_ih + b_hh          (reordered [i,f,o,g])
    h_out_ref,    # (tb, Hd)   f32
    c_out_ref,    # (tb, Hd)   f32
    alpha_out_ref,  # (tb, 1, T) f32  lane-dense attention weights
):
    h = h_ref[...]                      # (tb, Hd) f32
    c = c_ref[...]                      # (tb, Hd) f32
    bh = bh_ref[...]                    # (tb, T, D) bf16
    tb, T, D = bh.shape
    Hd = h.shape[-1]

    h_bf = h.astype(jnp.bfloat16)       # reused for hproj and the gate matmul

    # ---- attention: i2h projection as ONE flattened MXU matmul (M = tb*T) ----
    bh_flat = bh.reshape(tb * T, D)                                   # leading-dim collapse
    proj = jnp.dot(bh_flat, w_i2h_ref[...],
                   preferred_element_type=jnp.float32).reshape(tb, T, Hd)

    # h2h projection: one M=tb matmul
    hproj = (jnp.dot(h_bf, w_h2h_ref[...], preferred_element_type=jnp.float32)
             + b_h2h_ref[...])                                        # (tb, Hd) f32

    s = jnp.tanh(proj + hproj[:, None, :])                            # (tb, T, Hd) f32

    # score: contract Hd -> (tb, 1, T), T on the lane axis for the softmax
    w_score_b = jnp.broadcast_to(w_score_ref[...][None], (tb, 1, Hd))  # tiny (1 row)
    e = jnp.einsum('bqh,bth->bqt', w_score_b, s,
                   preferred_element_type=jnp.float32)                # (tb, 1, T)

    # softmax over T (lane axis); exact reciprocal -- alpha is a returned output
    m = jnp.max(e, axis=-1, keepdims=True)
    p = jnp.exp(e - m)
    denom = jnp.sum(p, axis=-1, keepdims=True)
    alpha = p * pl.reciprocal(denom)                                  # (tb, 1, T)
    alpha_out_ref[...] = alpha

    # ---- context vector: alpha @ batch_H (small batched matmul, f32) ----
    ctx = jnp.einsum('bqt,btd->bqd', alpha, bh.astype(jnp.float32),
                     preferred_element_type=jnp.float32)[:, 0, :]     # (tb, D)

    # ---- LSTM gates: three M=tb matmuls (context / one-hot / hidden weights) ----
    gates = (jnp.dot(ctx.astype(jnp.bfloat16), w_ctx_ref[...],
                     preferred_element_type=jnp.float32)
             + jnp.dot(oh_ref[...], w_emb_ref[...],
                       preferred_element_type=jnp.float32)
             + jnp.dot(h_bf, w_hh_ref[...],
                       preferred_element_type=jnp.float32)
             + b_lstm_ref[...])                                       # (tb, 4Hd) f32

    # gate columns are [i, f, o, g]: sigmoid on the first 3*Hd, tanh on the last Hd
    sig = jax.nn.sigmoid(gates[:, :3 * Hd])
    g_g = jnp.tanh(gates[:, 3 * Hd:])
    i_g = sig[:, :Hd]
    f_g = sig[:, Hd:2 * Hd]
    o_g = sig[:, 2 * Hd:3 * Hd]

    c_new = f_g * c + i_g * g_g
    h_new = o_g * jnp.tanh(c_new)

    h_out_ref[...] = h_new
    c_out_ref[...] = c_new


def attention_cell(prev_hidden, batch_H, char_onehots, semantics, params):
    """Pallas implementation of AttentionCell.forward. `semantics` is unused (matches PyTorch)."""
    del semantics  # unused in the reference forward pass
    h, c = prev_hidden
    B, T, D = batch_H.shape
    Hd = h.shape[-1]
    E = char_onehots.shape[-1]
    G = 4 * Hd
    bf16 = jnp.bfloat16

    # ---- parameter plumbing (cheap XLA glue; hoist out of the decode loop in practice) ----
    def reorder(w, axis=0):
        # PyTorch LSTM gate order [i, f, g, o] -> [i, f, o, g]
        i_, f_, g_, o_ = jnp.split(w, 4, axis=axis)
        return jnp.concatenate([i_, f_, o_, g_], axis=axis)

    w_ih = reorder(params["lstm_w_ih"])                              # (4Hd, D+E)
    w_hh = reorder(params["lstm_w_hh"])                              # (4Hd, Hd)
    b_lstm = (reorder(params["lstm_b_ih"])
              + reorder(params["lstm_b_hh"])).reshape(1, G).astype(jnp.float32)

    w_i2h_t = params["i2h_w"].T.astype(bf16)                         # (D, Hd)
    w_h2h_t = params["h2h_w"].T.astype(bf16)                         # (Hd, Hd)
    b_h2h = params["h2h_b"].reshape(1, Hd).astype(jnp.float32)       # (1, Hd)
    w_score = params["score_w"].reshape(1, Hd).astype(jnp.float32)   # (1, Hd)
    w_ctx_t = w_ih[:, :D].T.astype(bf16)                             # (D, 4Hd)
    w_emb_t = w_ih[:, D:].T.astype(bf16)                             # (E, 4Hd)
    w_hh_t = w_hh.T.astype(bf16)                                     # (Hd, 4Hd)

    bh_bf = batch_H.astype(bf16)
    oh_bf = char_onehots.astype(bf16)
    h = h.astype(jnp.float32)
    c = c.astype(jnp.float32)

    # batch tiling: 2 "parallel" tiles (one per v7x TensorCore) when sublane-aligned
    if B % 16 == 0:
        nb, tb = 2, B // 2
    else:
        nb, tb = 1, B

    def batch2(shape):
        return pl.BlockSpec(shape, lambda i: (i, 0))

    def batch3(shape):
        return pl.BlockSpec(shape, lambda i: (i, 0, 0))

    def full(shape):
        nd = len(shape)
        return pl.BlockSpec(shape, lambda i, nd=nd: (0,) * nd)

    # cost estimate (advisory)
    flops = 2 * B * (T * D * Hd + Hd * Hd + T * Hd + T * D + (D + E + Hd) * G)
    transcendentals = B * (T * Hd + T + 5 * Hd)
    bytes_accessed = (
        4 * 2 * B * Hd + 2 * B * T * D + 2 * B * E                    # activations in
        + 2 * (D * Hd + Hd * Hd + D * G + E * G + Hd * G)             # bf16 weights
        + 4 * (2 * Hd + G)                                            # f32 biases/score
        + 4 * (2 * B * Hd + B * T)                                    # outputs
    )

    # VMEM budget (per-tile blocks, double-buffered)
    block_bytes = (
        4 * 2 * tb * Hd + 2 * tb * T * D + 2 * tb * E
        + 2 * (D * Hd + Hd * Hd + D * G + E * G + Hd * G)
        + 4 * (2 * Hd + G)
        + 4 * (2 * tb * Hd + tb * T)
    )
    vmem_need = 2 * block_bytes + (1 << 20)
    cp_kwargs = dict(dimension_semantics=("parallel",))
    if vmem_need > 12 * (1 << 20):
        # raise past v5e's 16 MiB scoped default; stay below v7x's 64 MiB physical VMEM
        cp_kwargs["vmem_limit_bytes"] = int(min(vmem_need, 60 * (1 << 20)))

    h_out, c_out, alpha = pl.pallas_call(
        attention_cell_kernel,
        out_shape=(
            jax.ShapeDtypeStruct((B, Hd), jnp.float32),
            jax.ShapeDtypeStruct((B, Hd), jnp.float32),
            jax.ShapeDtypeStruct((B, 1, T), jnp.float32),   # lane-dense alpha
        ),
        grid_spec=pltpu.PrefetchScalarGridSpec(
            num_scalar_prefetch=0,
            grid=(nb,),
            in_specs=[
                batch2((tb, Hd)),       # h
                batch2((tb, Hd)),       # c
                batch3((tb, T, D)),     # batch_H (bf16)
                batch2((tb, E)),        # char_onehots (bf16)
                full((D, Hd)),          # w_i2h_t
                full((Hd, Hd)),         # w_h2h_t
                full((1, Hd)),          # b_h2h
                full((1, Hd)),          # w_score
                full((D, G)),           # w_ctx_t
                full((E, G)),           # w_emb_t
                full((Hd, G)),          # w_hh_t
                full((1, G)),           # b_lstm
            ],
            out_specs=[
                batch2((tb, Hd)),
                batch2((tb, Hd)),
                batch3((tb, 1, T)),
            ],
        ),
        compiler_params=pltpu.CompilerParams(**cp_kwargs),
        cost_estimate=pl.CostEstimate(
            flops=flops, transcendentals=transcendentals,
            bytes_accessed=bytes_accessed),
    )(h, c, bh_bf, oh_bf,
      w_i2h_t, w_h2h_t, b_h2h, w_score,
      w_ctx_t, w_emb_t, w_hh_t, b_lstm)

    # match PyTorch shapes: alpha (B, T, 1)
    return (h_out, c_out), alpha.reshape(B, T, 1)


def attention_cell_ref(prev_hidden, batch_H, char_onehots, params):
    """Pure-JAX reference mirroring the PyTorch forward (for verification)."""
    h, c = prev_hidden
    Hd = h.shape[-1]
    proj = jnp.einsum("btd,hd->bth", batch_H, params["i2h_w"])
    hproj = h @ params["h2h_w"].T + params["h2h_b"]
    e = jnp.einsum("bth,kh->btk", jnp.tanh(proj + hproj[:, None, :]), params["score_w"])
    alpha = jax.nn.softmax(e, axis=1)
    context = jnp.einsum("btk,btd->bd", alpha, batch_H)
    concat = jnp.concatenate([context, char_onehots], axis=1)
    gates = (concat @ params["lstm_w_ih"].T + params["lstm_b_ih"]
             + h @ params["lstm_w_hh"].T + params["lstm_b_hh"])
    i_g = jax.nn.sigmoid(gates[:, 0:Hd])
    f_g = jax.nn.sigmoid(gates[:, Hd:2 * Hd])
    g_g = jnp.tanh(gates[:, 2 * Hd:3 * Hd])
    o_g = jax.nn.sigmoid(gates[:, 3 * Hd:4 * Hd])
    c_new = f_g * c + i_g * g_g
    h_new = o_g * jnp.tanh(c_new)
    return (h_new, c_new), alpha


if __name__ == "__main__":
    B, T, D, Hd, E = 2, 8, 32, 32, 10   # batch, seq, input_size, hidden_size, num_embeddings
    key = jax.random.PRNGKey(0)
    ks = jax.random.split(key, 12)

    params = {
        "i2h_w": jax.random.normal(ks[0], (Hd, D), jnp.float32) * 0.1,
        "h2h_w": jax.random.normal(ks[1], (Hd, Hd), jnp.float32) * 0.1,
        "h2h_b": jax.random.normal(ks[2], (Hd,), jnp.float32) * 0.1,
        "score_w": jax.random.normal(ks[3], (1, Hd), jnp.float32) * 0.1,
        "lstm_w_ih": jax.random.normal(ks[4], (4 * Hd, D + E), jnp.float32) * 0.1,
        "lstm_w_hh": jax.random.normal(ks[5], (4 * Hd, Hd), jnp.float32) * 0.1,
        "lstm_b_ih": jax.random.normal(ks[6], (4 * Hd,), jnp.float32) * 0.1,
        "lstm_b_hh": jax.random.normal(ks[7], (4 * Hd,), jnp.float32) * 0.1,
    }

    h0 = jax.random.normal(ks[8], (B, Hd), jnp.float32)
    c0 = jax.random.normal(ks[9], (B, Hd), jnp.float32)
    batch_H = jax.random.normal(ks[10], (B, T, D), jnp.float32)
    char_ids = jax.random.randint(ks[11], (B,), 0, E)
    char_onehots = jax.nn.one_hot(char_ids, E, dtype=jnp.float32)
    semantics = jnp.zeros((B, Hd), jnp.float32)  # unused by the forward pass

    (h_new, c_new), alpha = attention_cell((h0, c0), batch_H, char_onehots, semantics, params)
    jax.block_until_ready((h_new, c_new, alpha))

    (h_ref, c_ref), alpha_ref = attention_cell_ref((h0, c0), batch_H, char_onehots, params)
    # tolerance accounts for the bf16 matmul operands (f32 accumulation, f32 elementwise)
    np.testing.assert_allclose(np.asarray(h_new), np.asarray(h_ref), rtol=2e-2, atol=2e-2)
    np.testing.assert_allclose(np.asarray(c_new), np.asarray(c_ref), rtol=2e-2, atol=2e-2)
    np.testing.assert_allclose(np.asarray(alpha), np.asarray(alpha_ref), rtol=2e-2, atol=2e-2)

    print("KERNEL_OK")
</pallas_src>

<mosaic_0001>
module attributes {stable_mosaic.version = 11 : i64} {
  func.func @attention_cell_kernel(%arg0: i32, %arg1: memref<2x32xf32, #tpu.memory_space<vmem>>, %arg2: memref<2x32xf32, #tpu.memory_space<vmem>>, %arg3: memref<2x8x32xbf16, #tpu.memory_space<vmem>>, %arg4: memref<2x10xbf16, #tpu.memory_space<vmem>>, %arg5: memref<32x32xbf16, #tpu.memory_space<vmem>>, %arg6: memref<32x32xbf16, #tpu.memory_space<vmem>>, %arg7: memref<1x32xf32, #tpu.memory_space<vmem>>, %arg8: memref<1x32xf32, #tpu.memory_space<vmem>>, %arg9: memref<32x128xbf16, #tpu.memory_space<vmem>>, %arg10: memref<10x128xbf16, #tpu.memory_space<vmem>>, %arg11: memref<32x128xbf16, #tpu.memory_space<vmem>>, %arg12: memref<1x128xf32, #tpu.memory_space<vmem>>, %arg13: memref<2x32xf32, #tpu.memory_space<vmem>>, %arg14: memref<2x32xf32, #tpu.memory_space<vmem>>, %arg15: memref<2x1x8xf32, #tpu.memory_space<vmem>>) attributes {dimension_semantics = [#tpu.dimension_semantics<parallel>], iteration_bounds = array<i64: 1>, scalar_prefetch = 0 : i64, scratch_operands = 0 : i64, tpu.core_type = #tpu.core_type<tc>, window_params = [{transform_indices = @transform_0, window_bounds = array<i64: 2, 32>}, {transform_indices = @transform_1, window_bounds = array<i64: 2, 32>}, {transform_indices = @transform_2, window_bounds = array<i64: 2, 8, 32>}, {transform_indices = @transform_3, window_bounds = array<i64: 2, 10>}, {pipeline_mode = #tpu.pipeline_mode<synchronous>, transform_indices = @transform_4, window_bounds = array<i64: 32, 32>}, {pipeline_mode = #tpu.pipeline_mode<synchronous>, transform_indices = @transform_5, window_bounds = array<i64: 32, 32>}, {pipeline_mode = #tpu.pipeline_mode<synchronous>, transform_indices = @transform_6, window_bounds = array<i64: 1, 32>}, {pipeline_mode = #tpu.pipeline_mode<synchronous>, transform_indices = @transform_7, window_bounds = array<i64: 1, 32>}, {pipeline_mode = #tpu.pipeline_mode<synchronous>, transform_indices = @transform_8, window_bounds = array<i64: 32, 128>}, {pipeline_mode = #tpu.pipeline_mode<synchronous>, transform_indices = @transform_9, window_bounds = array<i64: 10, 128>}, {pipeline_mode = #tpu.pipeline_mode<synchronous>, transform_indices = @transform_10, window_bounds = array<i64: 32, 128>}, {pipeline_mode = #tpu.pipeline_mode<synchronous>, transform_indices = @transform_11, window_bounds = array<i64: 1, 128>}, {transform_indices = @transform_12, window_bounds = array<i64: 2, 32>}, {transform_indices = @transform_13, window_bounds = array<i64: 2, 32>}, {transform_indices = @transform_14, window_bounds = array<i64: 2, 1, 8>}]} {
    %c0 = arith.constant 0 : index
    %c0_0 = arith.constant 0 : index
    %0 = vector.load %arg1[%c0, %c0_0] : memref<2x32xf32, #tpu.memory_space<vmem>>, vector<2x32xf32>
    %c0_1 = arith.constant 0 : index
    %c0_2 = arith.constant 0 : index
    %1 = vector.load %arg2[%c0_1, %c0_2] : memref<2x32xf32, #tpu.memory_space<vmem>>, vector<2x32xf32>
    %c0_3 = arith.constant 0 : index
    %c0_4 = arith.constant 0 : index
    %c0_5 = arith.constant 0 : index
    %2 = vector.load %arg3[%c0_3, %c0_4, %c0_5] : memref<2x8x32xbf16, #tpu.memory_space<vmem>>, vector<2x8x32xbf16>
    %3 = arith.truncf %0 : vector<2x32xf32> to vector<2x32xbf16>
    %4 = vector.shape_cast %2 : vector<2x8x32xbf16> to vector<16x32xbf16>
    %c0_6 = arith.constant 0 : index
    %c0_7 = arith.constant 0 : index
    %5 = vector.load %arg5[%c0_6, %c0_7] : memref<32x32xbf16, #tpu.memory_space<vmem>>, vector<32x32xbf16>
    %cst = arith.constant dense<0.000000e+00> : vector<16x32xf32>
    %6 = tpu.matmul %4, %5, %cst {dimension_numbers = #tpu.dot_dimension_numbers<[1], [0], [0], [1], [0, 0, 1, 1], [], []>} : vector<16x32xbf16>, vector<32x32xbf16>, vector<16x32xf32> -> vector<16x32xf32>
    %7 = vector.shape_cast %6 : vector<16x32xf32> to vector<2x8x32xf32>
    %c0_8 = arith.constant 0 : index
    %c0_9 = arith.constant 0 : index
    %8 = vector.load %arg6[%c0_8, %c0_9] : memref<32x32xbf16, #tpu.memory_space<vmem>>, vector<32x32xbf16>
    %cst_10 = arith.constant dense<0.000000e+00> : vector<2x32xf32>
    %9 = tpu.matmul %3, %8, %cst_10 {dimension_numbers = #tpu.dot_dimension_numbers<[1], [0], [0], [1], [0, 0, 1, 1], [], []>} : vector<2x32xbf16>, vector<32x32xbf16>, vector<2x32xf32> -> vector<2x32xf32>
    %c0_11 = arith.constant 0 : index
    %c0_12 = arith.constant 0 : index
    %10 = vector.load %arg7[%c0_11, %c0_12] : memref<1x32xf32, #tpu.memory_space<vmem>>, vector<1x32xf32>
    %11 = vector.broadcast %10 : vector<1x32xf32> to vector<2x32xf32>
    %12 = arith.addf %9, %11 : vector<2x32xf32>
    %13 = vector.shape_cast %12 : vector<2x32xf32> to vector<2x1x32xf32>
    %14 = vector.broadcast %13 : vector<2x1x32xf32> to vector<2x8x32xf32>
    %15 = arith.addf %7, %14 : vector<2x8x32xf32>
    %16 = math.tanh %15 : vector<2x8x32xf32>
    %c0_13 = arith.constant 0 : index
    %c0_14 = arith.constant 0 : index
    %17 = vector.load %arg8[%c0_13, %c0_14] : memref<1x32xf32, #tpu.memory_space<vmem>>, vector<1x32xf32>
    %18 = vector.shape_cast %17 : vector<1x32xf32> to vector<1x1x32xf32>
    %19 = vector.shape_cast %18 : vector<1x1x32xf32> to vector<1x1x32xf32>
    %20 = vector.broadcast %19 : vector<1x1x32xf32> to vector<2x1x32xf32>
    "tpu.trace_start"() <{level = 10 : i32, message = "bqh,bth->bqt"}> : () -> ()
    %cst_15 = arith.constant dense<0.000000e+00> : vector<2x1x8xf32>
    %21 = tpu.matmul %20, %16, %cst_15 {dimension_numbers = #tpu.dot_dimension_numbers<[2], [2], [1], [1], [0, 0, 0, 1, 1, 1], [0], [0]>} : vector<2x1x32xf32>, vector<2x8x32xf32>, vector<2x1x8xf32> -> vector<2x1x8xf32>
    "tpu.trace_stop"() : () -> ()
    %cst_16 = arith.constant dense<0xFF800000> : vector<2x1xf32>
    %22 = vector.multi_reduction <maximumf>, %21, %cst_16 [2] : vector<2x1x8xf32> to vector<2x1xf32>
    %23 = vector.shape_cast %22 : vector<2x1xf32> to vector<2x1x1xf32>
    %24 = vector.broadcast %23 : vector<2x1x1xf32> to vector<2x1x8xf32>
    %25 = arith.subf %21, %24 : vector<2x1x8xf32>
    %26 = math.exp %25 : vector<2x1x8xf32>
    %cst_17 = arith.constant dense<0.000000e+00> : vector<2x1xf32>
    %27 = vector.multi_reduction <add>, %26, %cst_17 [2] : vector<2x1x8xf32> to vector<2x1xf32>
    %28 = vector.shape_cast %27 : vector<2x1xf32> to vector<2x1x1xf32>
    %29 = tpu.reciprocal %28 : vector<2x1x1xf32> -> vector<2x1x1xf32>
    %30 = vector.broadcast %29 : vector<2x1x1xf32> to vector<2x1x8xf32>
    %31 = arith.mulf %26, %30 : vector<2x1x8xf32>
    %c0_18 = arith.constant 0 : index
    %c0_19 = arith.constant 0 : index
    %c0_20 = arith.constant 0 : index
    %32 = vector.load %arg15[%c0_18, %c0_19, %c0_20] : memref<2x1x8xf32, #tpu.memory_space<vmem>>, vector<2x1x8xf32>
    tpu.vector_store %arg15[%c0_18, %c0_19, %c0_20], %31 {strides = array<i32>} : memref<2x1x8xf32, #tpu.memory_space<vmem>>, vector<2x1x8xf32>,
    %33 = arith.extf %2 : vector<2x8x32xbf16> to vector<2x8x32xf32>
    "tpu.trace_start"() <{level = 10 : i32, message = "bqt,btd->bqd"}> : () -> ()
    %cst_21 = arith.constant dense<0.000000e+00> : vector<2x1x32xf32>
    %34 = tpu.matmul %31, %33, %cst_21 {dimension_numbers = #tpu.dot_dimension_numbers<[2], [1], [1], [2], [0, 0, 0, 1, 1, 2], [0], [0]>} : vector<2x1x8xf32>, vector<2x8x32xf32>, vector<2x1x32xf32> -> vector<2x1x32xf32>
    "tpu.trace_stop"() : () -> ()
    %35 = vector.shape_cast %34 : vector<2x1x32xf32> to vector<2x32xf32>
    %36 = arith.truncf %35 : vector<2x32xf32> to vector<2x32xbf16>
    %c0_22 = arith.constant 0 : index
    %c0_23 = arith.constant 0 : index
    %37 = vector.load %arg9[%c0_22, %c0_23] : memref<32x128xbf16, #tpu.memory_space<vmem>>, vector<32x128xbf16>
    %cst_24 = arith.constant dense<0.000000e+00> : vector<2x128xf32>
    %38 = tpu.matmul %36, %37, %cst_24 {dimension_numbers = #tpu.dot_dimension_numbers<[1], [0], [0], [1], [0, 0, 1, 1], [], []>} : vector<2x32xbf16>, vector<32x128xbf16>, vector<2x128xf32> -> vector<2x128xf32>
    %c0_25 = arith.constant 0 : index
    %c0_26 = arith.constant 0 : index
    %39 = vector.load %arg4[%c0_25, %c0_26] : memref<2x10xbf16, #tpu.memory_space<vmem>>, vector<2x10xbf16>
    %c0_27 = arith.constant 0 : index
    %c0_28 = arith.constant 0 : index
    %40 = vector.load %arg10[%c0_27, %c0_28] : memref<10x128xbf16, #tpu.memory_space<vmem>>, vector<10x128xbf16>
    %cst_29 = arith.constant dense<0.000000e+00> : vector<2x128xf32>
    %41 = tpu.matmul %39, %40, %cst_29 {dimension_numbers = #tpu.dot_dimension_numbers<[1], [0], [0], [1], [0, 0, 1, 1], [], []>} : vector<2x10xbf16>, vector<10x128xbf16>, vector<2x128xf32> -> vector<2x128xf32>
    %42 = arith.addf %38, %41 : vector<2x128xf32>
    %c0_30 = arith.constant 0 : index
    %c0_31 = arith.constant 0 : index
    %43 = vector.load %arg11[%c0_30, %c0_31] : memref<32x128xbf16, #tpu.memory_space<vmem>>, vector<32x128xbf16>
    %cst_32 = arith.constant dense<0.000000e+00> : vector<2x128xf32>
    %44 = tpu.matmul %3, %43, %cst_32 {dimension_numbers = #tpu.dot_dimension_numbers<[1], [0], [0], [1], [0, 0, 1, 1], [], []>} : vector<2x32xbf16>, vector<32x128xbf16>, vector<2x128xf32> -> vector<2x128xf32>
    %45 = arith.addf %42, %44 : vector<2x128xf32>
    %c0_33 = arith.constant 0 : index
    %c0_34 = arith.constant 0 : index
    %46 = vector.load %arg12[%c0_33, %c0_34] : memref<1x128xf32, #tpu.memory_space<vmem>>, vector<1x128xf32>
    %47 = vector.broadcast %46 : vector<1x128xf32> to vector<2x128xf32>
    %48 = arith.addf %45, %47 : vector<2x128xf32>
    %49 = vector.extract_strided_slice %48 {offsets = [0, 0], sizes = [2, 96], strides = [1, 1]} : vector<2x128xf32> to vector<2x96xf32>
    %50 = arith.negf %49 : vector<2x96xf32>
    %51 = math.exp %50 : vector<2x96xf32>
    %cst_35 = arith.constant 1.000000e+00 : f32
    %52 = vector.broadcast %cst_35 : f32 to vector<2x96xf32>
    %53 = arith.addf %52, %51 : vector<2x96xf32>
    %54 = arith.divf %52, %53 : vector<2x96xf32>
    %55 = vector.extract_strided_slice %48 {offsets = [0, 96], sizes = [2, 32], strides = [1, 1]} : vector<2x128xf32> to vector<2x32xf32>
    %56 = math.tanh %55 : vector<2x32xf32>
    %57 = vector.extract_strided_slice %54 {offsets = [0, 0], sizes = [2, 32], strides = [1, 1]} : vector<2x96xf32> to vector<2x32xf32>
    %58 = vector.extract_strided_slice %54 {offsets = [0, 32], sizes = [2, 32], strides = [1, 1]} : vector<2x96xf32> to vector<2x32xf32>
    %59 = vector.extract_strided_slice %54 {offsets = [0, 64], sizes = [2, 32], strides = [1, 1]} : vector<2x96xf32> to vector<2x32xf32>
    %60 = arith.mulf %58, %1 : vector<2x32xf32>
    %61 = arith.mulf %57, %56 : vector<2x32xf32>
    %62 = arith.addf %60, %61 : vector<2x32xf32>
    %63 = math.tanh %62 : vector<2x32xf32>
    %64 = arith.mulf %59, %63 : vector<2x32xf32>
    %c0_36 = arith.constant 0 : index
    %c0_37 = arith.constant 0 : index
    %65 = vector.load %arg13[%c0_36, %c0_37] : memref<2x32xf32, #tpu.memory_space<vmem>>, vector<2x32xf32>
    tpu.vector_store %arg13[%c0_36, %c0_37], %64 {strides = array<i32>} : memref<2x32xf32, #tpu.memory_space<vmem>>, vector<2x32xf32>,
    %c0_38 = arith.constant 0 : index
    %c0_39 = arith.constant 0 : index
    %66 = vector.load %arg14[%c0_38, %c0_39] : memref<2x32xf32, #tpu.memory_space<vmem>>, vector<2x32xf32>
    tpu.vector_store %arg14[%c0_38, %c0_39], %62 {strides = array<i32>} : memref<2x32xf32, #tpu.memory_space<vmem>>, vector<2x32xf32>,
    return
  }
  func.func @transform_0(%arg0: i32) -> (i32, i32) {
    %c0_i32 = arith.constant 0 : i32
    %c0_i32_0 = arith.constant 0 : i32
    return %arg0, %c0_i32 : i32, i32
  }
  func.func @transform_1(%arg0: i32) -> (i32, i32) {
    %c0_i32 = arith.constant 0 : i32
    %c0_i32_0 = arith.constant 0 : i32
    return %arg0, %c0_i32 : i32, i32
  }
  func.func @transform_2(%arg0: i32) -> (i32, i32, i32) {
    %c0_i32 = arith.constant 0 : i32
    %c0_i32_0 = arith.constant 0 : i32
    %c0_i32_1 = arith.constant 0 : i32
    return %arg0, %c0_i32, %c0_i32_0 : i32, i32, i32
  }
  func.func @transform_3(%arg0: i32) -> (i32, i32) {
    %c0_i32 = arith.constant 0 : i32
    %c0_i32_0 = arith.constant 0 : i32
    return %arg0, %c0_i32 : i32, i32
  }
  func.func @transform_4(%arg0: i32) -> (i32, i32) {
    %c0_i32 = arith.constant 0 : i32
    %c0_i32_0 = arith.constant 0 : i32
    %c0_i32_1 = arith.constant 0 : i32
    return %c0_i32, %c0_i32_0 : i32, i32
  }
  func.func @transform_5(%arg0: i32) -> (i32, i32) {
    %c0_i32 = arith.constant 0 : i32
    %c0_i32_0 = arith.constant 0 : i32
    %c0_i32_1 = arith.constant 0 : i32
    return %c0_i32, %c0_i32_0 : i32, i32
  }
  func.func @transform_6(%arg0: i32) -> (i32, i32) {
    %c0_i32 = arith.constant 0 : i32
    %c0_i32_0 = arith.constant 0 : i32
    %c0_i32_1 = arith.constant 0 : i32
    return %c0_i32, %c0_i32_0 : i32, i32
  }
  func.func @transform_7(%arg0: i32) -> (i32, i32) {
    %c0_i32 = arith.constant 0 : i32
    %c0_i32_0 = arith.constant 0 : i32
    %c0_i32_1 = arith.constant 0 : i32
    return %c0_i32, %c0_i32_0 : i32, i32
  }
  func.func @transform_8(%arg0: i32) -> (i32, i32) {
    %c0_i32 = arith.constant 0 : i32
    %c0_i32_0 = arith.constant 0 : i32
    %c0_i32_1 = arith.constant 0 : i32
    return %c0_i32, %c0_i32_0 : i32, i32
  }
  func.func @transform_9(%arg0: i32) -> (i32, i32) {
    %c0_i32 = arith.constant 0 : i32
    %c0_i32_0 = arith.constant 0 : i32
    %c0_i32_1 = arith.constant 0 : i32
    return %c0_i32, %c0_i32_0 : i32, i32
  }
  func.func @transform_10(%arg0: i32) -> (i32, i32) {
    %c0_i32 = arith.constant 0 : i32
    %c0_i32_0 = arith.constant 0 : i32
    %c0_i32_1 = arith.constant 0 : i32
    return %c0_i32, %c0_i32_0 : i32, i32
  }
  func.func @transform_11(%arg0: i32) -> (i32, i32) {
    %c0_i32 = arith.constant 0 : i32
    %c0_i32_0 = arith.constant 0 : i32
    %c0_i32_1 = arith.constant 0 : i32
    return %c0_i32, %c0_i32_0 : i32, i32
  }
  func.func @transform_12(%arg0: i32) -> (i32, i32) {
    %c0_i32 = arith.constant 0 : i32
    %c0_i32_0 = arith.constant 0 : i32
    return %arg0, %c0_i32 : i32, i32
  }
  func.func @transform_13(%arg0: i32) -> (i32, i32) {
    %c0_i32 = arith.constant 0 : i32
    %c0_i32_0 = arith.constant 0 : i32
    return %arg0, %c0_i32 : i32, i32
  }
  func.func @transform_14(%arg0: i32) -> (i32, i32, i32) {
    %c0_i32 = arith.constant 0 : i32
    %c0_i32_0 = arith.constant 0 : i32
    %c0_i32_1 = arith.constant 0 : i32
    return %arg0, %c0_i32, %c0_i32_0 : i32, i32, i32
  }
}

</mosaic_0001>

<bundles_post_ra>
// kernel: tpu_custom_call.1
= control target key start
LH: loop header
LB: loop body
LE: loop exit
PB: predicated region body
PF: predicated region fallthrough
CT: control target
= control target key end

     0   :  { %20 = vsyncpa [#allocation3], 0  ;;  %s1652_s0 = inlined_call_operand.hbm [shape: f32[2,32], index: 0, kind: input, shape index: {}]   ;;  %s1653_s1 = inlined_call_operand.vmem [shape: f32[2,32], index: 1, kind: input, shape index: {}]   ;;  %s1654_s2 = inlined_call_operand.hbm [shape: bf16[2,8,32], index: 2, kind: input, shape index: {}]   ;;  %s1655_s3 = inlined_call_operand.hbm [shape: bf16[2,10], index: 3, kind: input, shape index: {}]   ;;  %s1656_s4 = inlined_call_operand.hbm [shape: bf16[32,32], index: 4, kind: input, shape index: {}]   ;;  %s1657_s5 = inlined_call_operand.vmem [shape: bf16[32,32], index: 5, kind: input, shape index: {}]   ;;  %s1658_s6 = inlined_call_operand.hbm [shape: f32[1,32], index: 6, kind: input, shape index: {}]   ;;  %s1659_s7 = inlined_call_operand.hbm [shape: f32[1,32], index: 7, kind: input, shape index: {}]   ;;  %s1660_s8 = inlined_call_operand.hbm [shape: bf16[32,128], index: 8, kind: input, shape index: {}]   ;;  %s1661_s9 = inlined_call_operand.hbm [shape: bf16[10,128], index: 9, kind: input, shape index: {}]   ;;  %s1662_s10 = inlined_call_operand.vmem [shape: bf16[32,128], index: 10, kind: input, shape index: {}]   ;;  %s1663_s11 = inlined_call_operand.vmem [shape: f32[1,128], index: 11, kind: input, shape index: {}]   ;;  %s1664_s12 = inlined_call_operand.hbm [shape: f32[2,32], index: 12, kind: output, shape index: {0}]   ;;  %s1665_s13 = inlined_call_operand.hbm [shape: f32[2,32], index: 13, kind: output, shape index: {1}]   ;;  %s1666_s14 = inlined_call_operand.hbm [shape: f32[2,1,8], index: 14, kind: output, shape index: {2}]  }
   0x1   :  { %21 = vsyncpa [#allocation6], 0 }
   0x2   :  { %22 = vsyncpa [#allocation9], 0 }
   0x3   :  { %23 = vsyncpa [#allocation12], 0 }
   0x4   :  { %24 = vsyncpa [#allocation15], 0 }
   0x5   :  { %25 = vsyncpa [#allocation4], 0 }
   0x6   :  { %26 = vsyncpa [#allocation18], 0  ;;  %s1334_s29 = smov [#allocation5]   ;;  %s1078_s17 = scalar_lea.hbm %s1654_s2, 128 }
   0x7   :  { %s44_s30 = sshll.u32 %s1334_s29, 4  ;;  %p1079_p0 = scmp.ne.s32.totalorder %s1654_s2, %s1078_s17  ;;  %s45_s30 = int_to_ptr.vmem [resolvable:$true] %s44_s30 }
   0x8   :  { %p1082_p1 = scmp.lt.u32.totalorder %s1078_s17, %s1654_s2 }
   0xa   :  { %p1084_p2 = pnand %p1082_p1, %p1079_p0 }
   0xc   :  { %1087 = shalt.err (!%p1084_p2)
}
   0xd   :  { %s1088_s22 = scalar_lea.vmem %s45_s30, 128  ;;  %p1093_p4 = scmp.lt.s32.totalorder %s45_s30, %s45_s30 }
   0xe   :  { %p1089_p3 = scmp.ne.s32.totalorder %s45_s30, %s1088_s22  ;;  %p1094_p5 = scmp.lt.s32.totalorder %s1088_s22, %s1088_s22 }
  0x10   :  { %p1095_p6 = por %p1094_p5, %p1093_p4 }
  0x12   :  { %p1096_p7 = pnand %p1095_p6, %p1089_p3 }
  0x14   :  { %1099 = shalt.err (!%p1096_p7)
}
  0x15   :  { %s1335_s23 = smov 64   ;;  %s1336_s24 = smov 4  }
  0x16   :  { %50 = dma.hbm_to_vmem [thread:$0]  %s1654_s2, 128, %s45_s30, [#allocation6], %s1335_s23, %s1335_s23, %s1336_s24  }
  0x17   :  { %s1337_s27 = smov [#allocation8]   ;;  %s1338_s29 = smov [#allocation11]  }
  0x18   :  { %s66_s28 = sshll.u32 %s1337_s27, 4  ;;  %s91_s15 = sshll.u32 %s1338_s29, 4  ;;  %s67_s28 = int_to_ptr.vmem [resolvable:$true] %s66_s28  ;;  %s92_s15 = int_to_ptr.vmem [resolvable:$true] %s91_s15 }
  0x19   :  { %s1100_s18 = scalar_lea.hbm %s1656_s4, 256 }
  0x1a   :  { %p1101_p8 = scmp.ne.s32.totalorder %s1656_s4, %s1100_s18  ;;  %p1104_p9 = scmp.lt.u32.totalorder %s1100_s18, %s1656_s4 }
  0x1c   :  { %p1106_p10 = pnand %p1104_p9, %p1101_p8 }
  0x1e   :  { %1109 = shalt.err (!%p1106_p10)
}
  0x1f   :  { %s1110_s2 = scalar_lea.vmem %s67_s28, 256  ;;  %p1115_p12 = scmp.lt.s32.totalorder %s67_s28, %s67_s28 }
  0x20   :  { %p1111_p11 = scmp.ne.s32.totalorder %s67_s28, %s1110_s2  ;;  %p1116_p13 = scmp.lt.s32.totalorder %s1110_s2, %s1110_s2 }
  0x22   :  { %p1117_p0 = por %p1116_p13, %p1115_p12 }
  0x24   :  { %p1118_p1 = pnand %p1117_p0, %p1111_p11 }
  0x26   :  { %1121 = shalt.err (!%p1118_p1)
}
  0x27   :  { %72 = dma.hbm_to_vmem [thread:$0]  %s1656_s4, 256, %s67_s28, [#allocation9], %s1335_s23, %s1335_s23, %s1336_s24  }
  0x28   :  { %s1122_s29 = scalar_lea.hbm %s1659_s7, 16 }
  0x29   :  { %p1123_p2 = scmp.ne.s32.totalorder %s1659_s7, %s1122_s29  ;;  %p1126_p3 = scmp.lt.u32.totalorder %s1122_s29, %s1659_s7 }
  0x2b   :  { %p1128_p4 = pnand %p1126_p3, %p1123_p2 }
  0x2d   :  { %1131 = shalt.err (!%p1128_p4)
}
  0x2e   :  { %s1132_s20 = scalar_lea.vmem %s92_s15, 16  ;;  %s1136_s21 = scalar_lea.vmem %s92_s15, 32 }
  0x2f   :  { %p1133_p5 = scmp.ne.s32.totalorder %s92_s15, %s1132_s20  ;;  %p1137_p6 = scmp.lt.s32.totalorder %s92_s15, %s92_s15 }
  0x30   :  { %p1138_p7 = scmp.lt.s32.totalorder %s1136_s21, %s1132_s20 }
  0x32   :  { %p1139_p8 = por %p1138_p7, %p1137_p6 }
  0x34   :  { %p1140_p9 = pnand %p1139_p8, %p1133_p5 }
  0x36   :  { %1143 = shalt.err (!%p1140_p9)
}
  0x37   :  { %94 = dma.hbm_to_vmem [thread:$0]  %s1659_s7, 16, %s92_s15, [#allocation12]  }
  0x38   :  { %s1339_s22 = smov [#allocation2]   ;;  %s1340_s30 = smov [#allocation7]  }
  0x39   :  { %s33_s2 = sshll.u32 %s1339_s22, 4  ;;  %s57_s25 = sshll.u32 %s1340_s30, 4  ;;  %s34_s2 = int_to_ptr.vmem [resolvable:$true] %s33_s2  ;;  %s58_s25 = int_to_ptr.vmem [resolvable:$true] %s57_s25 }
  0x3a   :  { %s1144_s29 = scalar_lea.hbm %s1652_s0, 32 }
  0x3b   :  { %p1145_p10 = scmp.ne.s32.totalorder %s1652_s0, %s1144_s29  ;;  %p1148_p11 = scmp.lt.u32.totalorder %s1144_s29, %s1652_s0 }
  0x3d   :  { %p1150_p12 = pnand %p1148_p11, %p1145_p10 }
  0x3f   :  { %1153 = shalt.err (!%p1150_p12)
}
  0x40   :  { %s1154_s7 = scalar_lea.vmem %s34_s2, 32  ;;  %p1159_p0 = scmp.lt.s32.totalorder %s34_s2, %s34_s2 }
  0x41   :  { %p1155_p13 = scmp.ne.s32.totalorder %s34_s2, %s1154_s7  ;;  %p1160_p1 = scmp.lt.s32.totalorder %s1154_s7, %s1154_s7 }
  0x43   :  { %p1161_p2 = por %p1160_p1, %p1159_p0 }
  0x45   :  { %p1162_p3 = pnand %p1161_p2, %p1155_p13 }
  0x47   :  { %1165 = shalt.err (!%p1162_p3)
}
  0x48   :  { %36 = dma.hbm_to_vmem [thread:$0]  %s1652_s0, 32, %s34_s2, [#allocation3]  }
  0x49   :  { %s1166_s28 = scalar_lea.hbm %s1655_s3, 16 }
  0x4a   :  { %p1167_p4 = scmp.ne.s32.totalorder %s1655_s3, %s1166_s28  ;;  %p1170_p5 = scmp.lt.u32.totalorder %s1166_s28, %s1655_s3 }
  0x4c   :  { %p1172_p6 = pnand %p1170_p5, %p1167_p4 }
  0x4e   :  { %1175 = shalt.err (!%p1172_p6)
}
  0x4f   :  { %s1176_s29 = scalar_lea.vmem %s58_s25, 16  ;;  %s1180_s16 = scalar_lea.vmem %s58_s25, 32 }
  0x50   :  { %p1177_p7 = scmp.ne.s32.totalorder %s58_s25, %s1176_s29  ;;  %p1181_p8 = scmp.lt.s32.totalorder %s58_s25, %s58_s25 }
  0x51   :  { %p1182_p9 = scmp.lt.s32.totalorder %s1180_s16, %s1176_s29 }
  0x53   :  { %p1183_p10 = por %p1182_p9, %p1181_p8 }
  0x55   :  { %p1184_p11 = pnand %p1183_p10, %p1177_p7 }
  0x57   :  { %1187 = shalt.err (!%p1184_p11)
}
  0x58   :  { %60 = dma.hbm_to_vmem [thread:$0]  %s1655_s3, 16, %s58_s25, [#allocation6]  }
  0x59   :  { %s1341_s17 = smov [#allocation10]   ;;  %s1342_s19 = smov [#allocation13]  }
  0x5a   :  { %s81_s18 = sshll.u32 %s1341_s17, 4  ;;  %s100_s7 = sshll.u32 %s1342_s19, 4  ;;  %s82_s18 = int_to_ptr.vmem [resolvable:$true] %s81_s18  ;;  %s101_s7 = int_to_ptr.vmem [resolvable:$true] %s100_s7 }
  0x5b   :  { %s1188_s21 = scalar_lea.hbm %s1658_s6, 16 }
  0x5c   :  { %p1189_p12 = scmp.ne.s32.totalorder %s1658_s6, %s1188_s21  ;;  %p1192_p13 = scmp.lt.u32.totalorder %s1188_s21, %s1658_s6 }
  0x5e   :  { %p1194_p0 = pnand %p1192_p13, %p1189_p12 }
  0x60   :  { %1197 = shalt.err (!%p1194_p0)
}
  0x61   :  { %s1198_s3 = scalar_lea.vmem %s82_s18, 16  ;;  %s1202_s25 = scalar_lea.vmem %s82_s18, 32 }
  0x62   :  { %p1199_p1 = scmp.ne.s32.totalorder %s82_s18, %s1198_s3  ;;  %p1203_p2 = scmp.lt.s32.totalorder %s82_s18, %s82_s18 }
  0x63   :  { %p1204_p3 = scmp.lt.s32.totalorder %s1202_s25, %s1198_s3 }
  0x65   :  { %p1205_p4 = por %p1204_p3, %p1203_p2 }
  0x67   :  { %p1206_p5 = pnand %p1205_p4, %p1199_p1 }
  0x69   :  { %1209 = shalt.err (!%p1206_p5)
}
  0x6a   :  { %84 = dma.hbm_to_vmem [thread:$0]  %s1658_s6, 16, %s82_s18, [#allocation9]  }
  0x6b   :  { %s1210_s0 = scalar_lea.hbm %s1660_s8, 256 }
  0x6c   :  { %p1211_p6 = scmp.ne.s32.totalorder %s1660_s8, %s1210_s0  ;;  %p1214_p7 = scmp.lt.u32.totalorder %s1210_s0, %s1660_s8 }
  0x6e   :  { %p1216_p8 = pnand %p1214_p7, %p1211_p6 }
  0x70   :  { %1219 = shalt.err (!%p1216_p8)
}
  0x71   :  { %s1220_s20 = scalar_lea.vmem %s101_s7, 256  ;;  %p1225_p10 = scmp.lt.s32.totalorder %s101_s7, %s101_s7 }
  0x72   :  { %p1221_p9 = scmp.ne.s32.totalorder %s101_s7, %s1220_s20  ;;  %p1226_p11 = scmp.lt.s32.totalorder %s1220_s20, %s1220_s20 }
  0x74   :  { %p1227_p12 = por %p1226_p11, %p1225_p10 }
  0x76   :  { %p1228_p13 = pnand %p1227_p12, %p1221_p9 }
  0x78   :  { %1231 = shalt.err (!%p1228_p13)
}
  0x79   :  { %106 = dma.hbm_to_vmem [thread:$0]  %s1660_s8, 256, %s101_s7, [#allocation12], %s1335_s23, %s1335_s23, %s1336_s24  }
  0x7a   :  { %s1343_s21 = smov [#allocation14]   ;;  %s1232_s30 = scalar_lea.hbm %s1661_s9, 128 }
  0x7b   :  { %s112_s4 = sshll.u32 %s1343_s21, 4  ;;  %p1233_p0 = scmp.ne.s32.totalorder %s1661_s9, %s1232_s30  ;;  %s113_s4 = int_to_ptr.vmem [resolvable:$true] %s112_s4 }
  0x7c   :  { %p1236_p1 = scmp.lt.u32.totalorder %s1232_s30, %s1661_s9 }
  0x7e   :  { %p1238_p2 = pnand %p1236_p1, %p1233_p0 }
  0x80   :  { %1241 = shalt.err (!%p1238_p2)
}
  0x81   :  { %s1242_s29 = scalar_lea.vmem %s113_s4, 128  ;;  %p1247_p4 = scmp.lt.s32.totalorder %s113_s4, %s113_s4 }
  0x82   :  { %p1243_p3 = scmp.ne.s32.totalorder %s113_s4, %s1242_s29  ;;  %p1248_p5 = scmp.lt.s32.totalorder %s1242_s29, %s1242_s29 }
  0x84   :  { %p1249_p6 = por %p1248_p5, %p1247_p4 }
  0x86   :  { %p1250_p7 = pnand %p1249_p6, %p1243_p3 }
  0x88   :  { %1253 = shalt.err (!%p1250_p7)
}
  0x89   :  { %118 = dma.hbm_to_vmem [thread:$0]  %s1661_s9, 128, %s113_s4, [#allocation15], %s1335_s23, %s1335_s23, %s1336_s24  }
  0x8a   :  { %1320 = dma.done.wait [#allocation3], 32  }
  0x8b   :  { %1321 = vsyncadd [#allocation3], 4294967264 }
  0x8c   :  { %1322 = dma.done.wait [#allocation6], 144  }
  0x8d   :  { %1323 = vsyncadd [#allocation6], 4294967152 }
  0x8e   :  { %1324 = dma.done.wait [#allocation9], 272  }
  0x8f   :  { %1325 = vsyncadd [#allocation9], 4294967024 }
  0x90   :  { %1326 = dma.done.wait [#allocation12], 272  }
  0x91   :  { %1327 = vsyncadd [#allocation12], 4294967024 }
  0x92   :  { %1328 = dma.done.wait [#allocation15], 128  }
  0x93   :  { %1329 = vsyncadd [#allocation15], 4294967168  ;;  %v1344_v0 = vmov 0.0   ;;  %vm1345_vm0 = vmmov 0   ;;  %v1047_v1 = vld [vmem:[%s1657_s5] sm:$0xff]   ;;  %v1048_v2 = vld [vmem:[%s1657_s5 + $0x8] sm:$0xff]   ;;  %v289_v10 = vlaneseq }
  0x94   :  { %977 = vmatprep.subr.bf16.mxu1 %v1344_v0  ;;  %969 = vmatprep.subr.bf16.mxu0 %v1344_v0  ;;  %v1049_v3 = vld [vmem:[#allocation8] sm:$0xff]   ;;  %v148_v4 = vld [vmem:[#allocation2] sm:$0x3]  ;;  %vm174_vm1 = vcmask 261120   ;;  %v1050_v5 = vld [vmem:[#allocation8 + $0x8] sm:$0xff]   ;;  %vm472_vm2 = vcmask 57344  }
  0x95   :  { %981 = vmatprep.mubr.msk.bf16.mxu1 %vm1345_vm0, %v1344_v0  ;;  %973 = vmatprep.mubr.msk.bf16.mxu0 %vm1345_vm0, %v1344_v0  ;;  %v1550_v6 = vld [vmem:[#allocation5] sm:$0xff]   ;;  %v1552_v7 = vpack.c.bf16 %v148_v4, %v148_v4  ;;  %v1346_v8 = vmov 1966171168   ;;  %v290_v12 = vshrl.u32 %v289_v10, 7  ;;  %v927_v13 = vld [vmem:[#allocation10] ss:$0 sm:$0xff] }
  0x96   :  { %978 = vmatpush3.bf16.msra.mxu1 %v1047_v1  ;;  %970 = vmatpush3.bf16.msra.mxu0 %v1049_v3  ;;  %v287_v9 = vunpack.c.l.s4 %v1346_v8  ;;  %v322_v35 = vld [vmem:[#allocation11] sm:$0x1]  ;;  %v498_v52 = vunpack.c.h.bf16 %v1550_v6  ;;  %v497_v53 = vunpack.c.l.bf16 %v1550_v6  ;;  %vm499_vm3 = vcmask 64512   ;;  %v1052_v60 = vld [vmem:[#allocation14] sm:$0x1f]   ;;  %v1054_v63 = vld [vmem:[%s1662_s10] sm:$0xff]  }
  0x97   :  { %979 = vmatprep.subr.bf16.mxu1 %v1344_v0  ;;  %971 = vmatprep.subr.bf16.mxu0 %v1344_v0  ;;  %v310_v22 = vsub.s32 0, %v290_v12  ;;  %vm664_vm4 = vcmask 1044480   ;;  %v652_v62 = vld [vmem:[#allocation7] sm:$0x1]  ;;  %vm660_vm5 = vcmask 80896   ;;  %v1053_v1 = vld [vmem:[#allocation13] sm:$0xff]  }
  0x98   :  { %v288_v11 = vunpack.c.0.s8 %v287_v9  ;;  %v666_v61 = vsel %vm664_vm4, %v1052_v60, 0  ;;  %v1055_v3 = vld [vmem:[#allocation13 + $0x8] sm:$0xff]   ;;  %v149_v4 = vld [vmem:[%s1653_s1] sm:$0x3]  ;;  %s1347_s6 = smov 32   ;;  %vm713_vm6 = vcmask 1041409  }
  0x99   :  { %vm868_vm7 = vcmask 254976   ;;  %s1349_s18 = smov [#allocation17]  }
  0x9a   :  { %980 = vmatpush3.bf16.msra.mxu1 %v1048_v2  ;;  %972 = vmatpush3.bf16.msra.mxu0 %v1050_v5  ;;  %v291_v14 = vsub.s32 %v288_v11, %v290_v12  ;;  %v1056_v2 = vld [vmem:[%s1662_s10 + $0x8] sm:$0xff]   ;;  %s891_s21 = sshll.u32 %s1349_s18, 4  ;;  %s892_s21 = int_to_ptr.vmem [resolvable:$true] %s891_s21 }
  0x9b   :  { %990 = vmatprep.subr.mxu1 %v1344_v0  ;;  %985 = vmatprep.subr.mxu0 %v1344_v0  ;;  %s1254_s4 = scalar_lea.vmem %s892_s21, 32  ;;  %p1259_p9 = scmp.lt.s32.totalorder %s892_s21, %s892_s21 }
  0x9c   :  { %p1255_p8 = scmp.ne.s32.totalorder %s892_s21, %s1254_s4  ;;  %p1260_p10 = scmp.lt.s32.totalorder %s1254_s4, %s1254_s4 }
  0x9d   :  { %982 = vmatmul.mubr.msk.bf16.vlgmr.msra.gmra.mrb[0].mxu1 %vm174_vm1, %v1552_v7  ;;  %974 = vmatmul.mubr.msk.bf16.vlgmr.msra.gmra.mrb[0].mxu0 %vm174_vm1, %v1550_v6 }
  0x9e   :  { %992 = vmatprep.mubr.msk.f32.mxu1 %vm1345_vm0, %v1344_v0  ;;  %987 = vmatprep.mubr.msk.f32.mxu0 %vm1345_vm0, %v1344_v0  ;;  %p1261_p11 = por %p1260_p10, %p1259_p9 }
  0xa0   :  { %p1262_p12 = pnand %p1261_p11, %p1255_p8 }
 0x170   :  { %v279_v15 = vpop.f32.mrb[0].mxu1  ;;  %v212_v19 = vpop.f32.mrb[0].mxu0 }
 0x171   :  { %v280_v16 = vadd.f32 %v927_v13, %v279_v15  ;;  %v983_v17 = vpop.f32.mrb[1].mxu1  ;;  %v975_v23 = vpop.f32.mrb[1].mxu0 }
 0x172   :  { %v282_v18 = vpop.f32.mrb[2].mxu1  ;;  %v215_v24 = vpop.f32.mrb[2].mxu0 }
 0x173   :  { %v292_v20 = vrot.slane %v280_v16, %v291_v14  ;;  %v984_v21 = vpop.f32.mrb[3].mxu1  ;;  %v976_v27 = vpop.f32.mrb[3].mxu0 }
 0x174   :  { %v945_v27 = vld [vmem:[%s1663_s11] ss:$0 sm:$0xff]  ;;  %s1348_s11 = smov 96  }
 0x175   :  { %v293_v25 = vcombine.high %v292_v20, %v292_v20  ;;  %v300_v26 = vrot.slane %v292_v20, %v291_v14 }
 0x177   :  { %v311_v28 = vrot.slane %v300_v26, %v310_v22  ;;  %v307_v29 = vrot.slane %v293_v25, %v291_v14 }
 0x179   :  { %v318_v30 = vadd.f32 %v311_v28, %v212_v19  ;;  %v315_v31 = vrot.slane %v307_v29, %v310_v22 }
 0x17b   :  { %1058 = vtanh.f32 %v318_v30  ;;  %v319_v32 = vadd.f32 %v315_v31, %v215_v24 }
 0x17d   :  { %1060 = vtanh.f32 %v319_v32 }
 0x185   :  { %v1059_v33 = vpop.eup %1058 }
 0x186   :  { %986 = vmatpush3.xpose.msk.msra.mxu0 %vm174_vm1, %v1059_v33 }
 0x187   :  { %v1061_v34 = vpop.eup %1060  ;;  %995 = vmatprep.subr.mxu0 %v1344_v0 }
 0x188   :  { %991 = vmatpush3.xpose.msk.msra.mxu1 %vm174_vm1, %v1061_v34 }
 0x189   :  { %988 = vmatmul.mubr.msk.f32.vlgmr.msra.gmra.mrb[4].mxu0 %vm174_vm1, %v322_v35  ;;  %1000 = vmatprep.subr.mxu1 %v1344_v0 }
 0x18a   :  { %997 = vmatprep.mubr.msk.f32.mxu0 %vm1345_vm0, %v1344_v0  ;;  %996 = vmatpush3.msra.mxu0 %v497_v53 }
 0x18b   :  { %993 = vmatmul.mubr.msk.f32.vlgmr.msra.gmra.mrb[4].mxu1 %vm174_vm1, %v322_v35  ;;  %1005 = vmatprep.subr.bf16.mxu0 %v1344_v0 }
 0x18c   :  { %1002 = vmatprep.mubr.msk.f32.mxu1 %vm1345_vm0, %v1344_v0  ;;  %1001 = vmatpush3.msra.mxu1 %v498_v52 }
 0x18d   :  { %1011 = vmatprep.subr.bf16.mxu1 %v1344_v0 }
 0x25c   :  { %v395_v36 = vpop.f32.mrb[4].mxu0 }
 0x25d   :  { %v989_v37 = vpop.f32.mrb[5].mxu0  ;;  %v473_v41 = vsel %vm472_vm2, %v395_v36, -inf }
 0x25e   :  { %v468_v38 = vpop.f32.mrb[4].mxu1 }
 0x25f   :  { %v476_v39 = vsel %vm472_vm2, %v468_v38, -inf  ;;  %v994_v40 = vpop.f32.mrb[5].mxu1 }
 0x260   :  { %477 = vmax.xlane.f32.xlu0 %v476_v39 }
 0x264   :  { %474 = vmax.xlane.f32.xlu0 %v473_v41 }
 0x2ed   :  { %v478_v42 = vpop.xlane.xlu0 %477 }
 0x2ee   :  { %v480_v43 = vsub.f32 %v468_v38, %v478_v42 }
 0x2f0   :  { %v483_v44 = vmul.f32 1.442695, %v480_v43 }
 0x2f1   :  { %v475_v45 = vpop.xlane.xlu0 %474 }
 0x2f2   :  { %1062 = vpow2.f32 %v483_v44  ;;  %v479_v46 = vsub.f32 %v395_v36, %v475_v45 }
 0x2f4   :  { %v481_v47 = vmul.f32 1.442695, %v479_v46 }
 0x2f6   :  { %1064 = vpow2.f32 %v481_v47 }
 0x2fc   :  { %v1063_v48 = vpop.eup %1062 }
 0x2fd   :  { %v488_v49 = vsel %vm472_vm2, %v1063_v48, 0.0 }
 0x2fe   :  { %489 = vadd.xlane.f32.xlu1 %v488_v49 }
 0x300   :  { %v1065_v50 = vpop.eup %1064 }
 0x301   :  { %v485_v51 = vsel %vm472_vm2, %v1065_v50, 0.0 }
 0x302   :  { %486 = vadd.xlane.f32.xlu1 %v485_v51 }
 0x313   :  { %844 = vrot.lane.b32.xlu1 %v149_v4, %s1347_s6 }
 0x38b   :  { %v490_v54 = vpop.xlane.xlu1 %489 }
 0x38c   :  { %1066 = vrcp.f32 %v490_v54 }
 0x38f   :  { %v487_v55 = vpop.xlane.xlu1 %486 }
 0x390   :  { %1068 = vrcp.f32 %v487_v55 }
 0x393   :  { %v845_v38 = vpop.permute.xlu1 %844 }
 0x396   :  { %v1067_v56 = vpop.eup %1066 }
 0x397   :  { %v494_v57 = vmul.f32 %v1067_v56, %v1063_v48 }
 0x399   :  { %496 = vst.msk [vmem:[#allocation19 + $0x1] sm:$0x1] %vm472_vm2, %v494_v57  ;;  %1003 = vmatmul.mubr.msk.f32.vlgmr.msra.gmra.mrb[6].mxu1 %vm499_vm3, %v494_v57 }
 0x39a   :  { %v1069_v58 = vpop.eup %1068  ;;  %1015 = vmatprep.mubr.msk.bf16.mxu1 %vm1345_vm0, %v1344_v0  ;;  %1012 = vmatpush3.bf16.msra.mxu1 %v1053_v1 }
 0x39b   :  { %v493_v59 = vmul.f32 %v1069_v58, %v1065_v50  ;;  %1013 = vmatprep.subr.bf16.mxu1 %v1344_v0 }
 0x39d   :  { %495 = vst.msk [vmem:[#allocation19] sm:$0x1] %vm472_vm2, %v493_v59  ;;  %998 = vmatmul.mubr.msk.f32.vlgmr.msra.gmra.mrb[6].mxu0 %vm499_vm3, %v493_v59 }
 0x39e   :  { %1007 = vmatprep.mubr.msk.bf16.mxu0 %vm1345_vm0, %v1344_v0  ;;  %1006 = vmatpush3.bf16.msra.mxu0 %v666_v61 }
 0x39f   :  { %1019 = vmatprep.subr.bf16.mxu0 %v1344_v0  ;;  %1014 = vmatpush3.bf16.msra.mxu1 %v1055_v3 }
 0x3a1   :  { %1008 = vmatmul.mubr.msk.bf16.vlgmr.msra.gmra.mrb[8].mxu0 %vm660_vm5, %v652_v62 }
 0x3a2   :  { %1020 = vmatpush3.bf16.msra.mxu0 %v1054_v63  ;;  %1023 = vmatprep.mubr.msk.bf16.mxu0 %vm1345_vm0, %v1344_v0 }
 0x3a3   :  { %1021 = vmatprep.subr.bf16.mxu0 %v1344_v0 }
 0x3a6   :  { %1022 = vmatpush3.bf16.msra.mxu0 %v1056_v2 }
 0x3a9   :  { %1024 = vmatmul.mubr.msk.bf16.vlgmr.msra.gmra.mrb[12].mxu0 %vm174_vm1, %v1552_v7 }
 0x46c   :  { %v642_v5 = vpop.f32.mrb[6].mxu1 }
 0x46d   :  { %v647_v6 = vpack.c.bf16 %v642_v5, %v642_v5  ;;  %v1004_v0 = vpop.f32.mrb[7].mxu1 }
 0x46f   :  { %v711_v8 = vunpack.c.l.b16 %v647_v6 }
 0x470   :  { %v569_v9 = vpop.f32.mrb[6].mxu0 }
 0x471   :  { %v646_v10 = vpack.c.bf16 %v569_v9, %v569_v9  ;;  %v999_v11 = vpop.f32.mrb[7].mxu0  ;;  %v712_v12 = vrot.slane %v711_v8, 7 }
 0x473   :  { %v710_v13 = vunpack.c.l.b16 %v646_v10 }
 0x474   :  { %v702_v7 = vpop.f32.mrb[8].mxu0 }
 0x475   :  { %v714_v14 = vsel %vm713_vm6, %v712_v12, %v710_v13  ;;  %v1009_v16 = vpop.f32.mrb[9].mxu0 }
 0x476   :  { %v715_v15 = vpack.c.b16 %v714_v14, %v714_v14  ;;  %v705_v17 = vpop.f32.mrb[10].mxu0 }
 0x477   :  { %v1010_v18 = vpop.f32.mrb[11].mxu0 }
 0x478   :  { %1016 = vmatmul.mubr.msk.bf16.vlgmr.msra.gmra.mrb[8].mxu1 %vm174_vm1, %v715_v15 }
 0x47c   :  { %v821_v19 = vpop.f32.mrb[12].mxu0 }
 0x47d   :  { %v1025_v20 = vpop.f32.mrb[13].mxu0 }
 0x47e   :  { %v824_v21 = vpop.f32.mrb[14].mxu0 }
 0x47f   :  { %v1026_v22 = vpop.f32.mrb[15].mxu0 }
 0x54b   :  { %v765_v23 = vpop.f32.mrb[8].mxu1 }
 0x54c   :  { %v766_v24 = vadd.f32 %v765_v23, %v702_v7  ;;  %v1017_v25 = vpop.f32.mrb[9].mxu1 }
 0x54d   :  { %v768_v26 = vpop.f32.mrb[10].mxu1 }
 0x54e   :  { %v827_v28 = vadd.f32 %v821_v19, %v766_v24  ;;  %v1018_v29 = vpop.f32.mrb[11].mxu1 }
 0x550   :  { %v835_v30 = vadd.f32 %v945_v27, %v827_v28 }
 0x552   :  { %1070 = vtanh.f32 %v835_v30  ;;  %v946_v32 = vmul.f32 -1.442695, %v835_v30 }
 0x554   :  { %1072 = vpow2.f32 %v946_v32 }
 0x55c   :  { %v1071_v31 = vpop.eup %1070 }
 0x55d   :  { %849 = vrot.lane.b32.xlu0 %v1071_v31, %s1347_s6 }
 0x55e   :  { %v1073_v33 = vpop.eup %1072 }
 0x55f   :  { %v839_v34 = vadd.f32 1.0, %v1073_v33 }
 0x561   :  { %1074 = vrcp.f32 %v839_v34 }
 0x56b   :  { %v1075_v35 = vpop.eup %1074 }
 0x56c   :  { %v847_v39 = vmul.f32 %v1075_v35, %v845_v38 }
 0x5cf   :  { %v850_v36 = vpop.permute.xlu0 %849 }
 0x5d0   :  { %v852_v37 = vmul.f32 %v1075_v35, %v850_v36 }
 0x5d2   :  { %854 = vrot.lane.b32.xlu1 %v852_v37, %s1347_s6 }
 0x644   :  { %v855_v40 = vpop.permute.xlu1 %854 }
 0x645   :  { %v857_v41 = vadd.f32 %v855_v40, %v847_v39 }
 0x647   :  { %1076 = vtanh.f32 %v857_v41  ;;  %871 = vrot.lane.b32.xlu0 %v857_v41, %s1348_s11 }
 0x651   :  { %v1077_v42 = vpop.eup %1076 }
 0x652   :  { %860 = vrot.lane.b32.xlu1 %v1077_v42, %s1347_s6 }
 0x6b9   :  { %v872_v43 = vpop.permute.xlu0 %871 }
 0x6ba   :  { %874 = vst.msk [vmem:[#allocation17] sm:$0x3] %vm868_vm7, %v872_v43 }
 0x6bb   :  { %1265 = shalt.err (!%p1262_p12)
}
 0x6bc   :  { %s1266_s30 = scalar_lea.hbm %s1665_s13, 32 }
 0x6bd   :  { %p1267_p13 = scmp.ne.s32.totalorder %s1665_s13, %s1266_s30  ;;  %p1270_p0 = scmp.lt.u32.totalorder %s1266_s30, %s1665_s13 }
 0x6bf   :  { %p1272_p1 = pnand %p1270_p0, %p1267_p13 }
 0x6c1   :  { %1275 = shalt.err (!%p1272_p1)
}
 0x6c2   :  { %894 = dma.vmem_to_hbm [thread:$0]  %s892_s21, 32, %s1665_s13, [#allocation18]  }
 0x6c3   :  { %s1350_s7 = smov [#allocation19]  }
 0x6c4   :  { %s900_s9 = sshll.u32 %s1350_s7, 4  ;;  %s901_s9 = int_to_ptr.vmem [resolvable:$true] %s900_s9 }
 0x6c5   :  { %s1276_s24 = scalar_lea.vmem %s901_s9, 32  ;;  %p1281_p3 = scmp.lt.s32.totalorder %s901_s9, %s901_s9 }
 0x6c6   :  { %p1277_p2 = scmp.ne.s32.totalorder %s901_s9, %s1276_s24  ;;  %p1282_p4 = scmp.lt.s32.totalorder %s1276_s24, %s1276_s24 }
 0x6c8   :  { %p1283_p5 = por %p1282_p4, %p1281_p3 }
 0x6ca   :  { %p1284_p6 = pnand %p1283_p5, %p1277_p2 }
 0x6cc   :  { %1287 = shalt.err (!%p1284_p6)
}
 0x6cd   :  { %s1288_s5 = scalar_lea.hbm %s1666_s14, 32 }
 0x6ce   :  { %p1289_p7 = scmp.ne.s32.totalorder %s1666_s14, %s1288_s5  ;;  %p1292_p8 = scmp.lt.u32.totalorder %s1288_s5, %s1666_s14 }
 0x6d0   :  { %p1294_p9 = pnand %p1292_p8, %p1289_p7 }
 0x6d2   :  { %1297 = shalt.err (!%p1294_p9)
}
 0x6d3   :  { %s1351_s15 = smov 16   ;;  %s1352_s20 = smov 1   ;;  %v861_v44 = vpop.permute.xlu1 %860 }
 0x6d4   :  { %906 = dma.vmem_to_hbm [thread:$0]  %s901_s9, 32, %s1666_s14, [#allocation18], %s1351_s15, %s1351_s15, %s1352_s20   ;;  %v863_v45 = vmul.f32 %v1075_v35, %v861_v44 }
 0x6d5   :  { %s1353_s10 = smov [#allocation16]  }
 0x6d6   :  { %865 = vrot.lane.b32.xlu1 %v863_v45, %s1335_s23  ;;  %s881_s11 = sshll.u32 %s1353_s10, 4  ;;  %s882_s11 = int_to_ptr.vmem [resolvable:$true] %s881_s11 }
 0x6d7   :  { %s1298_s18 = scalar_lea.vmem %s882_s11, 32  ;;  %p1303_p11 = scmp.lt.s32.totalorder %s882_s11, %s882_s11 }
 0x6d8   :  { %p1299_p10 = scmp.ne.s32.totalorder %s882_s11, %s1298_s18  ;;  %p1304_p12 = scmp.lt.s32.totalorder %s1298_s18, %s1298_s18 }
 0x6da   :  { %p1305_p13 = por %p1304_p12, %p1303_p11 }
 0x6dc   :  { %p1306_p0 = pnand %p1305_p13, %p1299_p10 }
 0x748   :  { %v866_v46 = vpop.permute.xlu1 %865 }
 0x749   :  { %869 = vst.msk [vmem:[#allocation16] sm:$0x3] %vm868_vm7, %v866_v46 }
 0x74a   :  { %1309 = shalt.err (!%p1306_p0)
}
 0x74b   :  { %s1310_s14 = scalar_lea.hbm %s1664_s12, 32 }
 0x74c   :  { %p1311_p1 = scmp.ne.s32.totalorder %s1664_s12, %s1310_s14  ;;  %p1314_p2 = scmp.lt.u32.totalorder %s1310_s14, %s1664_s12 }
 0x74e   :  { %p1316_p3 = pnand %p1314_p2, %p1311_p1 }
 0x750   :  { %1319 = shalt.err (!%p1316_p3)
}
 0x751   :  { %884 = dma.vmem_to_hbm [thread:$0]  %s882_s11, 32, %s1664_s12, [#allocation4]  }
 0x752   :  { %1330 = dma.done.wait [#allocation4], 32  }
 0x753   :  { %1331 = vsyncadd [#allocation4], 4294967264 }
 0x754   :  { %1332 = dma.done.wait [#allocation18], 64  }
 0x755   :  { %1333 = vsyncadd [#allocation18], 4294967232 }
 0x756   :  { %916 = vsyncpa [#allocation3], 1 }
 0x757   :  { %917 = vsyncpa [#allocation6], 1 }
 0x758   :  { %918 = vsyncpa [#allocation9], 1 }
 0x759   :  { %919 = vsyncpa [#allocation12], 1 }
 0x75a   :  { %920 = vsyncpa [#allocation15], 1 }
 0x75b   :  { %921 = vsyncpa [#allocation4], 1 }
 0x75c   :  { %922 = vsyncpa [#allocation18], 1 }

</bundles_post_ra>
